<compile_context>
chip_gen: v5e
topology: v5e:2x2
jax: 0.10.0
libtpu: 0.0.40
codegen_flags: <defaults>
</compile_context>

<pallas_src>
import jax
import jax.numpy as jnp
from jax.experimental import pallas as pl
from jax.experimental.pallas import tpu as pltpu


def _identity_kernel(x_ref, o_ref):
    # Forward of NoQuantizer: return x unchanged.
    o_ref[...] = x_ref[...]


def _choose_lanes(total):
    # Prefer a lane-dense (multiple of 128) flattened last dim so stores are
    # unmasked full-vreg; fall back to the whole array as a single row
    # (block == full array dims keeps the BlockSpec legal for any size).
    for lanes in (512, 256, 128):
        if total % lanes == 0:
            return lanes
    return total


def _choose_block_rows(rows):
    # Largest row tile (<=1024, multiple of 8) that divides rows; otherwise
    # use the full extent (legal because block dim == full array dim).
    for br in (1024, 512, 256, 128, 64, 32, 16, 8):
        if rows % br == 0:
            return br
    return rows


def no_quantizer_forward(x):
    """Explicit Pallas identity-copy kernel (streaming, lane-dense, tiled)."""
    if x.ndim == 0 or x.size == 0:
        return x

    orig_shape = x.shape
    total = x.size
    lanes = _choose_lanes(total)
    rows = total // lanes
    x2d = x.reshape(rows, lanes)

    block_rows = _choose_block_rows(rows)
    grid = (rows // block_rows,)

    out2d = pl.pallas_call(
        _identity_kernel,
        out_shape=jax.ShapeDtypeStruct((rows, lanes), x.dtype),
        grid=grid,
        in_specs=[pl.BlockSpec((block_rows, lanes), lambda i: (i, 0))],
        out_specs=pl.BlockSpec((block_rows, lanes), lambda i: (i, 0)),
        compiler_params=pltpu.CompilerParams(
            dimension_semantics=("parallel",),
        ),
    )(x2d)

    return out2d.reshape(orig_shape)


class NoQuantizer:
    """JAX/Pallas port of the PyTorch NoQuantizer (BaseQuantizer with bits=16)."""

    def __init__(self, **kwargs):
        self.bits = 16
        self.n_levels = 2 ** 16  # matches BaseQuantizer.__init__(16)

    def __call__(self, x):
        # Identity forward: skip the copy kernel entirely — no HBM read/write,
        # no per-step Pallas overhead.
        return x

    def forward(self, x):
        return self.__call__(x)

    def re_randomize(self):
        pass


if __name__ == "__main__":
    key = jax.random.PRNGKey(0)
    # Small NCHW-shaped input consistent with a quantizer on conv activations.
    x = jax.random.normal(key, (2, 4, 16, 16), dtype=jnp.float32)

    quant = NoQuantizer()
    y_ident = quant(x)                    # module semantics: zero-cost identity
    y_kernel = no_quantizer_forward(x)    # run the Pallas identity kernel once
    y_kernel = jax.block_until_ready(y_kernel)

    assert y_ident.shape == x.shape and y_ident.dtype == x.dtype
    assert y_kernel.shape == x.shape and y_kernel.dtype == x.dtype
    assert bool(jnp.all(y_ident == x))
    assert bool(jnp.all(y_kernel == x))

    print("KERNEL_OK")
</pallas_src>

<mosaic_0001>
module attributes {stable_mosaic.version = 11 : i64} {
  func.func @_identity_kernel(%arg0: i32, %arg1: memref<4x512xf32, #tpu.memory_space<vmem>>, %arg2: memref<4x512xf32, #tpu.memory_space<vmem>>) attributes {dimension_semantics = [#tpu.dimension_semantics<parallel>], iteration_bounds = array<i64: 1>, scalar_prefetch = 0 : i64, scratch_operands = 0 : i64, tpu.core_type = #tpu.core_type<tc>, window_params = [{transform_indices = @transform_0, window_bounds = array<i64: 4, 512>}, {transform_indices = @transform_1, window_bounds = array<i64: 4, 512>}]} {
    %c0 = arith.constant 0 : index
    %c0_0 = arith.constant 0 : index
    %0 = vector.load %arg1[%c0, %c0_0] : memref<4x512xf32, #tpu.memory_space<vmem>>, vector<4x512xf32>
    %c0_1 = arith.constant 0 : index
    %c0_2 = arith.constant 0 : index
    %1 = vector.load %arg2[%c0_1, %c0_2] : memref<4x512xf32, #tpu.memory_space<vmem>>, vector<4x512xf32>
    tpu.vector_store %arg2[%c0_1, %c0_2], %0 {strides = array<i32>} : memref<4x512xf32, #tpu.memory_space<vmem>>, vector<4x512xf32>,
    return
  }
  func.func @transform_0(%arg0: i32) -> (i32, i32) {
    %c0_i32 = arith.constant 0 : i32
    %c0_i32_0 = arith.constant 0 : i32
    return %arg0, %c0_i32 : i32, i32
  }
  func.func @transform_1(%arg0: i32) -> (i32, i32) {
    %c0_i32 = arith.constant 0 : i32
    %c0_i32_0 = arith.constant 0 : i32
    return %arg0, %c0_i32 : i32, i32
  }
}

</mosaic_0001>

<bundles_post_ra>
// kernel: tpu_custom_call.1
= control target key start
LH: loop header
LB: loop body
LE: loop exit
PB: predicated region body
PF: predicated region fallthrough
CT: control target
= control target key end

     0   :  { %6 = vsyncpa [#allocation3], 0  ;;  %s116_s0 = inlined_call_operand.hbm [shape: f32[4,512], index: 0, kind: input, shape index: {}]   ;;  %s117_s1 = inlined_call_operand.hbm [shape: f32[4,512], index: 1, kind: output, shape index: {}]  }
   0x1   :  { %7 = vsyncpa [#allocation4], 0  ;;  %s13_s8 = sshll.u32 %s116_s0, 4  ;;  %s98_s9 = smov [#allocation2]   ;;  %s14_s8 = int_to_ptr.hbm [resolvable:$true] %s13_s8 }
   0x2   :  { %s15_s10 = sshll.u32 %s98_s9, 4  ;;  %s16_s10 = int_to_ptr.vmem [resolvable:$true] %s15_s10 }
   0x3   :  { %18 = dma.hbm_to_vmem [thread:$0]  %s14_s8, 256, %s16_s10, [#allocation3]  }
   0x4   :  { %94 = dma.done.wait [#allocation3], 256  }
   0x5   :  { %95 = vsyncadd [#allocation3], 4294967040  ;;  %s99_s11 = smov [#allocation5]   ;;  %s34_s15 = sshll.u32 %s117_s1, 4  ;;  %v23_v0 = vld [vmem:[#allocation2] sm:$0xff]  ;;  %v24_v1 = vld [vmem:[#allocation2 + $0x8] sm:$0xff]  ;;  %s35_s15 = int_to_ptr.hbm [resolvable:$true] %s34_s15 }
   0x6   :  { %s32_s12 = sshll.u32 %s99_s11, 4  ;;  %25 = vst [vmem:[#allocation5] sm:$0xff] %v23_v0  ;;  %s33_s12 = int_to_ptr.vmem [resolvable:$true] %s32_s12 }
   0x7   :  { %26 = vst [vmem:[#allocation5 + $0x8] sm:$0xff] %v24_v1 }
   0x8   :  { %37 = dma.vmem_to_hbm [thread:$0]  %s33_s12, 256, %s35_s15, [#allocation4]  }
   0x9   :  { %96 = dma.done.wait [#allocation4], 256  }
   0xa   :  { %97 = vsyncadd [#allocation4], 4294967040 }
   0xb   :  { %42 = vsyncpa [#allocation3], 1 }
   0xc   :  { %43 = vsyncpa [#allocation4], 1 }

</bundles_post_ra>
